<compile_context>
chip_gen: v7x
topology: tpu7x:2x2x1
jax: 0.10.0
libtpu: 0.0.40
codegen_flags: <defaults>
</compile_context>

<pallas_src>
import jax
import jax.numpy as jnp
from jax.experimental import pallas as pl
from jax.experimental.pallas import tpu as pltpu


_BN_EPS = 1e-5
# Pipeline budget: 2 streams (x, out) x double buffering must stay well under
# scoped VMEM on every generation (v7x has only 64 MiB physical per TC).
_VMEM_BLOCK_BUDGET = 24 * 1024 * 1024
_VMEM_LIMIT_BYTES = 48 * 1024 * 1024


def _round_up(a, m):
    return (a + m - 1) // m * m


def _pick_tiles(n, c, hw, itemsize):
    """Choose (tn, tc, th) so 2 x (x + out) blocks stay under the VMEM budget."""
    max_elems = max(1, _VMEM_BLOCK_BUDGET // (4 * itemsize))  # in + out, 2-buffered
    hw_pad = _round_up(hw, 128)
    # Spatial tile: lane-dense multiple of 128, leaving room for >= 8 channel rows.
    th_cap = max(128, ((max_elems // 8) // 128) * 128)
    th = min(hw_pad, th_cap)
    rows = max(8, max_elems // th)                  # how many (1, 1, th) rows fit
    tc = min(_round_up(c, 8), (rows // 8) * 8)      # channel tile, multiple of 8
    tn = max(1, min(n, rows // tc))                 # batch several images per step
    return tn, tc, th


def _scale_shift_kernel(x_ref, s_ref, b_ref, o_ref):
    # x_ref: (TN, TC, TH); s_ref / b_ref: (TN, TC, 1) -- broadcast over spatial.
    x = x_ref[...].astype(jnp.float32)
    o_ref[...] = (x * s_ref[...] + b_ref[...]).astype(o_ref.dtype)


@jax.jit
def botch_norm(x, params):
    """x: (N, C, H, W); params hold Linear(2C -> C) weights in torch layout."""
    n, c, h, w = x.shape
    hw = h * w
    xf = x.reshape(n, c, hw).astype(jnp.float32)

    # ---- statistics (small reductions, computed once in XLA) ---------------
    mean_nc = jnp.mean(xf, axis=-1)                       # (N, C)
    std_nc = jnp.sqrt(jnp.var(xf, axis=-1, ddof=1))       # torch.std: unbiased
    bn_mean = jnp.mean(xf, axis=(0, 2))                   # (C,)  batch stats
    bn_var = jnp.var(xf, axis=(0, 2))                     # (C,)  biased, like BN
    # TODO(synk): eval-mode BatchNorm2d would use running stats instead.
    bn_inv = jax.lax.rsqrt(bn_var + _BN_EPS)              # (C,)

    # ---- adaptive scale / bias: one fused (N, 2C) @ (2C, 2C) matmul --------
    feats = jnp.concatenate([mean_nc, std_nc], axis=1)    # (N, 2C)
    w_cat = jnp.concatenate([params["w_scale"].T, params["w_bias"].T], axis=1)
    b_cat = jnp.concatenate([params["b_scale"], params["b_bias"]])
    aff = feats @ w_cat + b_cat[None, :]                  # (N, 2C)
    scale_a, bias_a = aff[:, :c], aff[:, c:]              # (N, C) each

    # Fold BatchNorm into the per-(n, c) affine:
    #   scale_a * (x - bn_mean) * bn_inv + bias_a == eff_scale * x + eff_bias
    eff_scale = scale_a * bn_inv[None, :]                 # (N, C)
    eff_bias = bias_a - bn_mean[None, :] * eff_scale      # (N, C)

    # ---- Pallas: fused multiply-add over the whole feature map -------------
    tn, tc, th = _pick_tiles(n, c, hw, x.dtype.itemsize)
    np_, cp, hwp = _round_up(n, tn), _round_up(c, tc), _round_up(hw, th)

    x_pad = jnp.pad(x.reshape(n, c, hw),
                    ((0, np_ - n), (0, cp - c), (0, hwp - hw)))
    s_pad = jnp.pad(eff_scale, ((0, np_ - n), (0, cp - c)))[:, :, None]
    b_pad = jnp.pad(eff_bias, ((0, np_ - n), (0, cp - c)))[:, :, None]

    grid = (np_ // tn, cp // tc, hwp // th)
    out_pad = pl.pallas_call(
        _scale_shift_kernel,
        out_shape=jax.ShapeDtypeStruct((np_, cp, hwp), x.dtype),
        grid_spec=pltpu.PrefetchScalarGridSpec(
            num_scalar_prefetch=0,
            grid=grid,
            in_specs=[
                pl.BlockSpec((tn, tc, th), lambda i, j, k: (i, j, k)),  # x
                pl.BlockSpec((tn, tc, 1), lambda i, j, k: (i, j, 0)),   # eff_scale
                pl.BlockSpec((tn, tc, 1), lambda i, j, k: (i, j, 0)),   # eff_bias
            ],
            out_specs=pl.BlockSpec((tn, tc, th), lambda i, j, k: (i, j, k)),
        ),
        compiler_params=pltpu.CompilerParams(
            dimension_semantics=("parallel", "parallel", "parallel"),
            vmem_limit_bytes=_VMEM_LIMIT_BYTES),
    )(x_pad, s_pad, b_pad)

    return out_pad[:n, :c, :hw].reshape(n, c, h, w)


def _reference(x, params, bn_eps=_BN_EPS):
    """Literal (unfused) re-implementation of BotchNorm.forward."""
    n, c, h, w = x.shape
    flat = x.reshape(n, c, -1)
    mean_nc = flat.mean(axis=-1)
    std_nc = jnp.sqrt(jnp.var(flat, axis=-1, ddof=1))
    bn_mean = x.mean(axis=(0, 2, 3))
    bn_var = jnp.var(x, axis=(0, 2, 3))
    bn = (x - bn_mean[None, :, None, None]) / jnp.sqrt(
        bn_var[None, :, None, None] + bn_eps)
    feats = jnp.concatenate([mean_nc, std_nc], axis=1)
    bias = feats @ params["w_bias"].T + params["b_bias"]      # additive head
    scale = feats @ params["w_scale"].T + params["b_scale"]   # multiplicative head
    return scale[:, :, None, None] * bn + bias[:, :, None, None]


def _spectral_normalize(wmat, n_iter=30):
    # Emulate torch spectral_norm: W / sigma_max(W), sigma via power iteration.
    v = jnp.ones((wmat.shape[1],), wmat.dtype) / jnp.sqrt(float(wmat.shape[1]))
    u = wmat @ v
    for _ in range(n_iter):
        u = wmat @ v
        u = u / (jnp.linalg.norm(u) + 1e-12)
        v = wmat.T @ u
        v = v / (jnp.linalg.norm(v) + 1e-12)
    sigma = u @ (wmat @ v)
    return wmat / sigma


def init_params(key, in_size):
    # nn.Linear(2*in_size, in_size) default init, then spectral normalization.
    fan_in = 2 * in_size
    bound = 1.0 / jnp.sqrt(float(fan_in))
    ks = jax.random.split(key, 4)
    u = lambda k, shape: jax.random.uniform(
        k, shape, jnp.float32, minval=-bound, maxval=bound)
    return {
        "w_scale": _spectral_normalize(u(ks[0], (in_size, fan_in))),
        "b_scale": u(ks[1], (in_size,)),
        "w_bias": _spectral_normalize(u(ks[2], (in_size, fan_in))),
        "b_bias": u(ks[3], (in_size,)),
    }


if __name__ == "__main__":
    N, C, H, W = 2, 4, 16, 16

    key = jax.random.PRNGKey(0)
    kx, kp = jax.random.split(key)
    x = jax.random.normal(kx, (N, C, H, W), jnp.float32)
    params = init_params(kp, C)

    out = botch_norm(x, params)
    out = jax.block_until_ready(out)

    ref = _reference(x, params)
    assert out.shape == x.shape
    assert jnp.allclose(out, ref, atol=1e-4, rtol=1e-4), (
        "mismatch vs reference, max abs err = "
        f"{float(jnp.max(jnp.abs(out - ref)))}")

    print("KERNEL_OK")
</pallas_src>

<mosaic_0001>
module attributes {stable_mosaic.version = 11 : i64} {
  func.func @_scale_shift_kernel(%arg0: i32, %arg1: i32, %arg2: i32, %arg3: memref<2x8x256xf32, #tpu.memory_space<vmem>>, %arg4: memref<2x8x1xf32, #tpu.memory_space<vmem>>, %arg5: memref<2x8x1xf32, #tpu.memory_space<vmem>>, %arg6: memref<2x8x256xf32, #tpu.memory_space<vmem>>) attributes {dimension_semantics = [#tpu.dimension_semantics<parallel>, #tpu.dimension_semantics<parallel>, #tpu.dimension_semantics<parallel>], iteration_bounds = array<i64: 1, 1, 1>, scalar_prefetch = 0 : i64, scratch_operands = 0 : i64, tpu.core_type = #tpu.core_type<tc>, window_params = [{transform_indices = @transform_0, window_bounds = array<i64: 2, 8, 256>}, {transform_indices = @transform_1, window_bounds = array<i64: 2, 8, 1>}, {transform_indices = @transform_2, window_bounds = array<i64: 2, 8, 1>}, {transform_indices = @transform_3, window_bounds = array<i64: 2, 8, 256>}]} {
    %c0 = arith.constant 0 : index
    %c0_0 = arith.constant 0 : index
    %c0_1 = arith.constant 0 : index
    %0 = vector.load %arg3[%c0, %c0_0, %c0_1] : memref<2x8x256xf32, #tpu.memory_space<vmem>>, vector<2x8x256xf32>
    %c0_2 = arith.constant 0 : index
    %c0_3 = arith.constant 0 : index
    %c0_4 = arith.constant 0 : index
    %1 = vector.load %arg4[%c0_2, %c0_3, %c0_4] : memref<2x8x1xf32, #tpu.memory_space<vmem>>, vector<2x8x1xf32>
    %2 = vector.broadcast %1 : vector<2x8x1xf32> to vector<2x8x256xf32>
    %3 = arith.mulf %0, %2 : vector<2x8x256xf32>
    %c0_5 = arith.constant 0 : index
    %c0_6 = arith.constant 0 : index
    %c0_7 = arith.constant 0 : index
    %4 = vector.load %arg5[%c0_5, %c0_6, %c0_7] : memref<2x8x1xf32, #tpu.memory_space<vmem>>, vector<2x8x1xf32>
    %5 = vector.broadcast %4 : vector<2x8x1xf32> to vector<2x8x256xf32>
    %6 = arith.addf %3, %5 : vector<2x8x256xf32>
    %c0_8 = arith.constant 0 : index
    %c0_9 = arith.constant 0 : index
    %c0_10 = arith.constant 0 : index
    %7 = vector.load %arg6[%c0_8, %c0_9, %c0_10] : memref<2x8x256xf32, #tpu.memory_space<vmem>>, vector<2x8x256xf32>
    tpu.vector_store %arg6[%c0_8, %c0_9, %c0_10], %6 {strides = array<i32>} : memref<2x8x256xf32, #tpu.memory_space<vmem>>, vector<2x8x256xf32>,
    return
  }
  func.func @transform_0(%arg0: i32, %arg1: i32, %arg2: i32) -> (i32, i32, i32) {
    %c0_i32 = arith.constant 0 : i32
    return %arg0, %arg1, %arg2 : i32, i32, i32
  }
  func.func @transform_1(%arg0: i32, %arg1: i32, %arg2: i32) -> (i32, i32, i32) {
    %c0_i32 = arith.constant 0 : i32
    %c0_i32_0 = arith.constant 0 : i32
    return %arg0, %arg1, %c0_i32 : i32, i32, i32
  }
  func.func @transform_2(%arg0: i32, %arg1: i32, %arg2: i32) -> (i32, i32, i32) {
    %c0_i32 = arith.constant 0 : i32
    %c0_i32_0 = arith.constant 0 : i32
    return %arg0, %arg1, %c0_i32 : i32, i32, i32
  }
  func.func @transform_3(%arg0: i32, %arg1: i32, %arg2: i32) -> (i32, i32, i32) {
    %c0_i32 = arith.constant 0 : i32
    return %arg0, %arg1, %arg2 : i32, i32, i32
  }
}

</mosaic_0001>

<bundles_post_ra>
// kernel: botch_norm.1
= control target key start
LH: loop header
LB: loop body
LE: loop exit
PB: predicated region body
PF: predicated region fallthrough
CT: control target
= control target key end

     0   :  { %v61_v0 = vmov 0   ;;  %s118_s2 = inlined_call_operand.vmem [shape: f32[2,8,1], index: 2, kind: input, shape index: {}]   ;;  %s119_s1 = inlined_call_operand.vmem [shape: f32[2,8,1], index: 1, kind: input, shape index: {}]   ;;  %s120_s0 = inlined_call_operand.vmem [shape: f32[2,8,256], index: 0, kind: input, shape index: {}]   ;;  %s121_s3 = inlined_call_operand.vmem [shape: f32[2,8,256], index: 3, kind: output, shape index: {}]  }
   0x1   :  { %60 = vset.pattern.permute.xlu1 %v61_v0  ;;  %59 = vset.pattern.permute.xlu0 %v61_v0  ;;  %v34_v1 = vld [vmem:[%s118_s2] sm:$0xff]  ;;  %v35_v3 = vld [vmem:[%s118_s2 + $0x8] sm:$0xff]  ;;  %v16_v11 = vld [vmem:[%s120_s0 + $0x10] sm:$0xff] }
   0x2   :  { %v18_v2 = vld [vmem:[%s119_s1] sm:$0xff]  ;;  %38 = vperm.xlu1 %60, %v34_v1   ;;  %v19_v4 = vld [vmem:[%s119_s1 + $0x8] sm:$0xff]  ;;  %v17_v12 = vld [vmem:[%s120_s0 + $0x18] sm:$0xff] }
   0x3   :  { %22 = vperm.xlu0 %59, %v18_v2   ;;  %v14_v5 = vld [vmem:[%s120_s0] sm:$0xff]  ;;  %v15_v6 = vld [vmem:[%s120_s0 + $0x8] sm:$0xff] }
   0x6   :  { %43 = vperm.xlu1 %60, %v35_v3  }
   0x7   :  { %27 = vperm.xlu0 %59, %v19_v4  }
  0x81   :  { %v39_v7 = vpop.permute.xlu1 %38 }
  0x82   :  { %v23_v8 = vpop.permute.xlu0 %22 }
  0x83   :  { %v30_v9 = vmul.f32 %v23_v8, %v14_v5  ;;  %v31_v10 = vmul.f32 %v23_v8, %v15_v6 }
  0x85   :  { %v46_v13 = vadd.f32 %v39_v7, %v30_v9  ;;  %v47_v14 = vadd.f32 %v39_v7, %v31_v10  ;;  %v44_v18 = vpop.permute.xlu1 %43 }
  0x86   :  { %v28_v15 = vpop.permute.xlu0 %27 }
  0x87   :  { %50 = vst [vmem:[%s121_s3] sm:$0xff] %v46_v13  ;;  %51 = vst [vmem:[%s121_s3 + $0x8] sm:$0xff] %v47_v14  ;;  %v32_v16 = vmul.f32 %v28_v15, %v16_v11  ;;  %v33_v17 = vmul.f32 %v28_v15, %v17_v12 }
  0x89   :  { %v48_v19 = vadd.f32 %v44_v18, %v32_v16  ;;  %v49_v20 = vadd.f32 %v44_v18, %v33_v17 }
  0x8b   :  { %52 = vst [vmem:[%s121_s3 + $0x10] sm:$0xff] %v48_v19  ;;  %53 = vst [vmem:[%s121_s3 + $0x18] sm:$0xff] %v49_v20 }

</bundles_post_ra>
